<compile_context>
chip_gen: v7x
topology: tpu7x:2x2x1
jax: 0.10.0
libtpu: 0.0.40
codegen_flags: <defaults>
</compile_context>

<pallas_src>
import functools

import numpy as np
import jax
import jax.numpy as jnp
from jax.experimental import pallas as pl
from jax.experimental.pallas import tpu as pltpu


_LANES = 128          # lane-dense output / padded pos-grid width
_ROW_ALIGN = 16       # multiple of 8 (f32 sublane) and 16 (bf16 sublane packing)
_NEG_FILL = -1e9      # fill for padded spatial lanes (exp -> 0)


def _round_up(n, m):
    return ((n + m - 1) // m) * m


# ----------------------------- Pallas kernels --------------------------------


def _spatial_softmax_kernel(x_ref, pos_ref, out_ref):
    """Plain path: one grid step = TN softmax rows (rows are batch*channel).

    x_ref   : [TN, HWp]   flattened feature rows (native dtype)
    pos_ref : [HWp, 128]  bf16 coordinate grid, lanes 0..1 = (x, y), rest zero
    out_ref : [TN, 128]   bf16 expected coordinates (lanes 0..1 meaningful)
    """
    x = x_ref[...].astype(jnp.float32)                         # upcast in VMEM/vregs

    # numerically-stable softmax numerator / denominator (normalize AFTER the
    # matmul so the per-row reciprocal is applied to [TN,128], not [TN,HW]).
    m = jnp.max(x, axis=-1, keepdims=True)                     # [TN, 1]
    p = jnp.exp(x - m)                                         # [TN, HWp] f32
    s = jnp.sum(p, axis=-1, keepdims=True)                     # [TN, 1]

    # expected (x, y) per row: one bf16 MXU matmul, f32 accumulation.
    xy = jnp.dot(p.astype(jnp.bfloat16), pos_ref[...],
                 preferred_element_type=jnp.float32)           # [TN, 128]

    inv = pl.reciprocal(s, approx=True)                        # [TN, 1] (EUP)
    out_ref[...] = (xy * inv).astype(out_ref.dtype)


def _spatial_softmax_kp_kernel(x_ref, w_ref, pos_ref, out_ref, *, hw):
    """Fused num_kp path: 1x1 conv + softmax + expected-xy for one batch item.

    x_ref   : [1, C, HWp]  feature maps of one batch item (native dtype)
    w_ref   : [K, C]       1x1-conv weight
    pos_ref : [HWp, 128]   bf16 coordinate grid
    out_ref : [1, K, 128]  bf16 expected coordinates (lanes 0..1 meaningful)
    """
    x = x_ref[0].astype(jnp.float32)                           # [C, HWp]
    w = w_ref[...].astype(jnp.float32)                         # [K, C]

    # 1x1 conv == channel matmul.  The conv bias is intentionally dropped:
    # softmax over the spatial axis is shift-invariant per keypoint row, so a
    # per-keypoint bias cannot change the output keypoints.
    feat = jnp.dot(w, x, preferred_element_type=jnp.float32)   # [K, HWp]

    hw_pad = feat.shape[-1]
    if hw_pad != hw:  # only traced when H*W is not a multiple of 128
        lane = jax.lax.broadcasted_iota(jnp.int32, feat.shape, 1)
        feat = jnp.where(lane < hw, feat, _NEG_FILL)

    m = jnp.max(feat, axis=-1, keepdims=True)                  # [K, 1]
    p = jnp.exp(feat - m)                                      # [K, HWp]
    s = jnp.sum(p, axis=-1, keepdims=True)                     # [K, 1]

    xy = jnp.dot(p.astype(jnp.bfloat16), pos_ref[...],
                 preferred_element_type=jnp.float32)           # [K, 128]

    inv = pl.reciprocal(s, approx=True)
    out_ref[0] = (xy * inv).astype(out_ref.dtype)


# ------------------------------ JAX wrapper -----------------------------------


def make_pos_grid(H, W):
    """Same buffer the PyTorch module registers: (H*W, 2) f32, col0=x, col1=y."""
    px, py = np.meshgrid(np.linspace(-1.0, 1.0, W), np.linspace(-1.0, 1.0, H))
    pos = np.concatenate([px.reshape(-1, 1), py.reshape(-1, 1)],
                         axis=1).astype(np.float32)
    return jnp.asarray(pos)


@functools.lru_cache(maxsize=None)
def _padded_pos_grid(H, W):
    """(round_up(H*W,128), 128) bf16 grid; lanes 0..1 = (x, y). Built once."""
    px, py = np.meshgrid(np.linspace(-1.0, 1.0, W), np.linspace(-1.0, 1.0, H))
    hw = H * W
    hw_pad = _round_up(hw, _LANES)
    pos = np.zeros((hw_pad, _LANES), np.float32)
    pos[:hw, 0] = px.reshape(-1)
    pos[:hw, 1] = py.reshape(-1)
    return jnp.asarray(pos, dtype=jnp.bfloat16)


def _derive_row_tile(n_rows, hw_pad, in_itemsize, *,
                     vmem_budget=24 << 20, max_tile=2048):
    """Row tile: as big as the VMEM budget allows (fits v7x's 32 MiB scoped
    default), capped so the grid has >= 2 steps so both v7x TCs get work."""
    n_round = _round_up(max(n_rows, 1), _ROW_ALIGN)
    per_row = 2 * hw_pad * in_itemsize + 2 * _LANES * 2   # dbl-buf input + bf16 out
    fixed = 2 * hw_pad * _LANES * 2                       # dbl-buf bf16 pos grid
    cap = max((vmem_budget - fixed) // per_row, _ROW_ALIGN)
    cap = max(_ROW_ALIGN, (min(cap, max_tile) // _ROW_ALIGN) * _ROW_ALIGN)
    if n_round >= 2 * _ROW_ALIGN:
        # >=2 grid steps: lets the "parallel" axis shard across both v7x
        # TensorCores; costs one extra ~0.35us step on single-TC v5e/v6e.
        tn = min(cap, _round_up(pl.cdiv(n_round, 2), _ROW_ALIGN))
    else:
        tn = n_round
    return tn


def spatial_softmax(features, kp_weight=None, kp_bias=None):
    """features: [B, C, H, W] -> keypoints [B, K, 2] (same dtype as features)."""
    B, C, H, W = features.shape
    hw = H * W
    hw_pad = _round_up(hw, _LANES)
    pos_pad = _padded_pos_grid(H, W)
    out_dtype = features.dtype

    if kp_weight is not None:
        # ---- fused num_kp path: 1x1 conv runs inside the kernel -------------
        # TODO(synk): kp_bias is dropped on purpose — softmax over H*W is
        # shift-invariant per row, so the bias cannot affect the keypoints.
        del kp_bias
        K = kp_weight.shape[0]
        x = features.reshape(B, C, hw)                 # contiguous: free reshape
        if hw_pad != hw:                               # ragged H*W only
            x = jnp.pad(x, ((0, 0), (0, 0), (0, hw_pad - hw)))
        kernel = functools.partial(_spatial_softmax_kp_kernel, hw=hw)
        out = pl.pallas_call(
            kernel,
            out_shape=jax.ShapeDtypeStruct((B, K, _LANES), jnp.bfloat16),
            grid_spec=pltpu.PrefetchScalarGridSpec(
                num_scalar_prefetch=0,
                grid=(B,),
                in_specs=[
                    pl.BlockSpec((1, C, hw_pad), lambda b: (b, 0, 0)),
                    pl.BlockSpec((K, C), lambda b: (0, 0)),
                    pl.BlockSpec((hw_pad, _LANES), lambda b: (0, 0)),
                ],
                out_specs=pl.BlockSpec((1, K, _LANES), lambda b: (b, 0, 0)),
            ),
            compiler_params=pltpu.CompilerParams(
                dimension_semantics=("parallel",)),     # megacore on v7x
        )(x, kp_weight, pos_pad)
        return out[:, :, :2].astype(out_dtype)

    # ---- plain path: keypoints == channels -----------------------------------
    K = C
    N = B * K
    flat = features.reshape(N, hw)                     # native dtype, free reshape
    if hw_pad != hw:
        # ragged spatial dim: pad lanes with a large negative so exp -> 0
        flat = jnp.pad(flat, ((0, 0), (0, hw_pad - hw)),
                       constant_values=_NEG_FILL)

    tn = _derive_row_tile(N, hw_pad, jnp.dtype(features.dtype).itemsize)
    grid = pl.cdiv(N, tn)

    out = pl.pallas_call(
        _spatial_softmax_kernel,
        # output is padded to grid*tn rows; input rows are NOT padded (the
        # pipeline handles the partial last block and we slice the result).
        out_shape=jax.ShapeDtypeStruct((grid * tn, _LANES), jnp.bfloat16),
        grid_spec=pltpu.PrefetchScalarGridSpec(
            num_scalar_prefetch=0,
            grid=(grid,),
            in_specs=[
                pl.BlockSpec((tn, hw_pad), lambda i: (i, 0)),   # feature rows
                pl.BlockSpec((hw_pad, _LANES), lambda i: (0, 0)),  # coord grid
            ],
            out_specs=pl.BlockSpec((tn, _LANES), lambda i: (i, 0)),
        ),
        compiler_params=pltpu.CompilerParams(
            dimension_semantics=("parallel",)),          # megacore on v7x
    )(flat, pos_pad)

    return out[:N, :2].astype(out_dtype).reshape(B, K, 2)


# ---------------------------- pure-JAX reference ------------------------------


def _ref_spatial_softmax(features, pos_grid, kp_weight=None, kp_bias=None):
    B, C, H, W = features.shape
    f = features.astype(jnp.float32)
    if kp_weight is not None:
        f = (jnp.einsum("bchw,kc->bkhw", f, kp_weight)
             + kp_bias[None, :, None, None])
    K = f.shape[1]
    flat = f.reshape(B * K, H * W)
    att = jax.nn.softmax(flat, axis=-1)
    xy = att @ pos_grid
    return xy.reshape(B, K, 2)


# ----------------------------------- main -------------------------------------

if __name__ == "__main__":
    B, C, H, W = 2, 32, 16, 16      # batch, channels, feature-map height/width
    K = 16                          # num_kp for the learnable-projection path

    key = jax.random.PRNGKey(0)
    k_f, k_w, k_b = jax.random.split(key, 3)
    features = jax.random.normal(k_f, (B, C, H, W), jnp.float32)
    kp_w = jax.random.normal(k_w, (K, C), jnp.float32) * 0.1
    kp_b = jax.random.normal(k_b, (K,), jnp.float32) * 0.1

    # num_kp=None path (keypoints = channels)
    out_plain = spatial_softmax(features)
    # num_kp=K path (fused 1x1 conv projection)
    out_kp = spatial_softmax(features, kp_w, kp_b)
    jax.block_until_ready((out_plain, out_kp))

    # correctness vs. pure-JAX reference
    pos_grid = make_pos_grid(H, W)
    ref_plain = _ref_spatial_softmax(features, pos_grid)
    ref_kp = _ref_spatial_softmax(features, pos_grid, kp_w, kp_b)
    np.testing.assert_allclose(np.asarray(out_plain, dtype=np.float32),
                               np.asarray(ref_plain), rtol=2e-2, atol=1e-2)
    np.testing.assert_allclose(np.asarray(out_kp, dtype=np.float32),
                               np.asarray(ref_kp), rtol=2e-2, atol=1e-2)

    print("KERNEL_OK")
</pallas_src>

<mosaic_0001>
module attributes {stable_mosaic.version = 11 : i64} {
  func.func @_spatial_softmax_kernel(%arg0: i32, %arg1: memref<32x256xf32, #tpu.memory_space<vmem>>, %arg2: memref<256x128xbf16, #tpu.memory_space<vmem>>, %arg3: memref<32x128xbf16, #tpu.memory_space<vmem>>) attributes {dimension_semantics = [#tpu.dimension_semantics<parallel>], iteration_bounds = array<i64: 2>, scalar_prefetch = 0 : i64, scratch_operands = 0 : i64, tpu.core_type = #tpu.core_type<tc>, window_params = [{transform_indices = @transform_0, window_bounds = array<i64: 32, 256>}, {pipeline_mode = #tpu.pipeline_mode<synchronous>, transform_indices = @transform_1, window_bounds = array<i64: 256, 128>}, {transform_indices = @transform_2, window_bounds = array<i64: 32, 128>}]} {
    %c0 = arith.constant 0 : index
    %c0_0 = arith.constant 0 : index
    %0 = vector.load %arg1[%c0, %c0_0] : memref<32x256xf32, #tpu.memory_space<vmem>>, vector<32x256xf32>
    %cst = arith.constant dense<0xFF800000> : vector<32xf32>
    %1 = vector.multi_reduction <maximumf>, %0, %cst [1] : vector<32x256xf32> to vector<32xf32>
    %2 = vector.shape_cast %1 : vector<32xf32> to vector<32x1xf32>
    %3 = vector.broadcast %2 : vector<32x1xf32> to vector<32x256xf32>
    %4 = arith.subf %0, %3 : vector<32x256xf32>
    %5 = math.exp %4 : vector<32x256xf32>
    %cst_1 = arith.constant dense<0.000000e+00> : vector<32xf32>
    %6 = vector.multi_reduction <add>, %5, %cst_1 [1] : vector<32x256xf32> to vector<32xf32>
    %7 = vector.shape_cast %6 : vector<32xf32> to vector<32x1xf32>
    %8 = arith.truncf %5 : vector<32x256xf32> to vector<32x256xbf16>
    %c0_2 = arith.constant 0 : index
    %c0_3 = arith.constant 0 : index
    %9 = vector.load %arg2[%c0_2, %c0_3] : memref<256x128xbf16, #tpu.memory_space<vmem>>, vector<256x128xbf16>
    %cst_4 = arith.constant dense<0.000000e+00> : vector<32x128xf32>
    %10 = tpu.matmul %8, %9, %cst_4 {dimension_numbers = #tpu.dot_dimension_numbers<[1], [0], [0], [1], [0, 0, 1, 1], [], []>} : vector<32x256xbf16>, vector<256x128xbf16>, vector<32x128xf32> -> vector<32x128xf32>
    %11 = tpu.reciprocal %7 {approx = true} : vector<32x1xf32> -> vector<32x1xf32>
    %12 = vector.broadcast %11 : vector<32x1xf32> to vector<32x128xf32>
    %13 = arith.mulf %10, %12 : vector<32x128xf32>
    %14 = arith.truncf %13 : vector<32x128xf32> to vector<32x128xbf16>
    %c0_5 = arith.constant 0 : index
    %c0_6 = arith.constant 0 : index
    %15 = vector.load %arg3[%c0_5, %c0_6] : memref<32x128xbf16, #tpu.memory_space<vmem>>, vector<32x128xbf16>
    tpu.vector_store %arg3[%c0_5, %c0_6], %14 {strides = array<i32>} : memref<32x128xbf16, #tpu.memory_space<vmem>>, vector<32x128xbf16>,
    return
  }
  func.func @transform_0(%arg0: i32) -> (i32, i32) {
    %c0_i32 = arith.constant 0 : i32
    %c0_i32_0 = arith.constant 0 : i32
    return %arg0, %c0_i32 : i32, i32
  }
  func.func @transform_1(%arg0: i32) -> (i32, i32) {
    %c0_i32 = arith.constant 0 : i32
    %c0_i32_0 = arith.constant 0 : i32
    %c0_i32_1 = arith.constant 0 : i32
    return %c0_i32, %c0_i32_0 : i32, i32
  }
  func.func @transform_2(%arg0: i32) -> (i32, i32) {
    %c0_i32 = arith.constant 0 : i32
    %c0_i32_0 = arith.constant 0 : i32
    return %arg0, %c0_i32 : i32, i32
  }
}

</mosaic_0001>

<bundles_post_ra>
// kernel: tpu_custom_call.1
= control target key start
LH: loop header
LB: loop body
LE: loop exit
PB: predicated region body
PF: predicated region fallthrough
CT: control target
= control target key end

     0   :  { %7 = vsyncpa [#allocation3], 0  ;;  %s1133_s0 = inlined_call_operand.hbm [shape: f32[64,256], index: 0, kind: input, shape index: {}]   ;;  %s1134_s1 = inlined_call_operand.hbm [shape: bf16[256,128], index: 1, kind: input, shape index: {}]   ;;  %s1135_s2 = inlined_call_operand.hbm [shape: bf16[64,128], index: 2, kind: output, shape index: {}]  }
   0x1   :  { %9 = vsyncpa [#allocation3 + $0x1], 0 }
   0x2   :  { %10 = vsyncpa [#allocation6], 0 }
   0x3   :  { %11 = vsyncpa [#allocation4], 0 }
   0x4   :  { %13 = vsyncpa [#allocation4 + $0x1], 0  ;;  %s899_s9 = smov 0   ;;  %s901_s10 = smov 0  }
   0x5   :  { %s903_s11 = smov 0   ;;  %s905_s12 = smov 0  }
   0x6 LB: > { %s920_s13 = sadd.s32 4294967295, %s873_s12   ;;  %s543_s14 = sadd.s32 4294967294, %s873_s12   ;;  %s873_s12 = sphi %s905_s12, %s1155_s12   ;;  %s869_s11 = sphi %s903_s11, %s1154_s11   ;;  %s865_s10 = sphi %s901_s10, %s1153_s10   ;;  %s861_s9 = sphi %s899_s9, %s1152_s9  }
   0x7   : > { %p39_p0 = scmp.ne.s32.totalorder %s865_s10, %s861_s9  ;;  %p1136_p1 = scmp.eq.s32.totalorder %s920_s13, 0 }
   0x8   : > { %p90_p3 = scmp.eq.s32.totalorder %s543_s14, 1  ;;  %p544_p5 = scmp.ge.s32.totalorder %s873_s12, 1 }
   0x9   : > { %p929_p4 = por %p1136_p1, %p39_p0  ;;  %p97_p7 = scmp.lt.s32.totalorder %s873_s12, 3 }
   0xa   : > { %p934_p6 = por %p90_p3, %p39_p0  ;;  %s875_s18 = smov [#allocation5]  }
   0xb   : > { %s1139_s15 = scalar_select %p929_p4, 1, 0 }
   0xc   : > { %s1140_s16 = scalar_select %p934_p6, 1, 0 }
   0xd   : > { %p939_p8 = pnand %p544_p5, %p97_p7  ;;  %s109_s19 = sshll.u32 %s875_s18, 4  ;;  %s943_s19 = int_to_ptr.vmem [resolvable:$true] %s109_s19 }
   0xe   : > { %s955_s21 = sadd.s32 1, %s873_s12   ;;  %s26_s22 = sadd.s32 1, %s869_s11 }
   0xf   : > { %s1141_s17 = scalar_select %p939_p8, 1, 0 }
  0x10   : > { %p650_p9 = pneg %p939_p8  ;;  %s23_s23 = ssub.s32 %s873_s12, %s955_s21 }
  0x11   : > { %s745_s26 = scalar_lea.hbm %s1134_s1, 2048 }
  0x12   : > { %p950_p11 = pnand %p650_p9, %p1136_p1  ;;  %p746_p12 = scmp.ne.s32.totalorder %s1134_s1, %s745_s26 }
  0x13   : > { %p752_p5 = scmp.lt.u32.totalorder %s745_s26, %s1134_s1 }
  0x14   : > { %p747_p13 = pneg %p950_p11 }
  0x16   : > { %p748_p0 = pnand %p747_p13, %p746_p12 }
  0x18   : > { %p749_p3 = pneg %p748_p0 }
  0x1a   : > { %p754_p7 = pnand %p752_p5, %p749_p3 }
  0x1c   : > { %757 = shalt.err (!%p754_p7)
}
  0x1d   : > { %s758_s3 = scalar_lea.vmem %s943_s19, 2048  ;;  %p766_p2 = scmp.lt.s32.totalorder %s943_s19, %s943_s19 }
  0x1e   : > { %p759_p9 = scmp.ne.s32.totalorder %s943_s19, %s758_s3  ;;  %p767_p6 = scmp.lt.s32.totalorder %s758_s3, %s758_s3 }
  0x20   : > { %p761_p10 = pnand %p759_p9, %p747_p13  ;;  %p768_p4 = por %p767_p6, %p766_p2 }
  0x22   : > { %p762_p1 = pneg %p761_p10 }
  0x24   : > { %p769_p8 = pnand %p768_p4, %p762_p1 }
  0x26   : > { %772 = shalt.err (!%p769_p8)
}
  0x27   : > { %s876_s4 = smov 64   ;;  %s877_s5 = smov 4  }
  0x28   : > { %653 = dma.hbm_to_vmem [thread:$0]  (!%p950_p11), %s1134_s1, 2048, %s943_s19, [#allocation6], %s876_s4, %s876_s4, %s877_s5  }
  0x29   : > { %p24_p2 = scmp.eq.s32.totalorder %s23_s23, 0  ;;  %p33_p1 = scmp.ne.s32.totalorder %s869_s11, %s865_s10 }
  0x2a   : > { %p34_p4 = scmp.eq.s32.totalorder %s873_s12, 0  ;;  %p663_p6 = scmp.lt.s32.totalorder %s873_s12, 2 }
  0x2b   : > { %s986_s8 = scalar_select %p24_p2, %s869_s11, %s26_s22  }
  0x2c   : > { %p35_p8 = por %p34_p4, %p33_p1  ;;  %p1143_p10 = scmp.eq.s32.totalorder %s920_s13, 1 }
  0x2d   : > { %s123_s18 = sand.u32 1, %s869_s11   ;;  %s581_s24 = sshll.u32 %s873_s12, 10 }
  0x2e   : > { %p990_p12 = por %p1143_p10, %p33_p1  ;;  %s547_s25 = sshll.u32 %s123_s18, 6 }
  0x2f   : > { %s999_s27 = scalar_lea.hbm %s1133_s0, %s581_s24  ;;  %s127_s19 = scalar_lea.vmem [#allocation2], %s547_s25 }
  0x30   : > { %s135_s22 = sshll.u32 %s127_s19, 4  ;;  %p1001_p11 = pnand %p663_p6, %p35_p8  ;;  %s1005_s22 = int_to_ptr.vmem [resolvable:$true] %s135_s22 }
  0x31   : > { %s1007_s28 = scalar_lea.sflag [#allocation3], %s123_s18  ;;  %s773_s29 = scalar_lea.hbm %s999_s27, 1024 }
  0x32   : > { %p774_p13 = scmp.ne.s32.totalorder %s999_s27, %s773_s29  ;;  %p775_p0 = pneg %p1001_p11 }
  0x33   : > { %s778_s4 = scalar_lea.hbm %s1133_s0, 2048  ;;  %p779_p7 = scmp.lt.u32.totalorder %s999_s27, %s1133_s0 }
  0x34   : > { %p776_p3 = pnand %p775_p0, %p774_p13  ;;  %p780_p9 = scmp.lt.u32.totalorder %s778_s4, %s773_s29 }
  0x35   : > { %p782_p1 = scmp.lt.u32.totalorder %s773_s29, %s999_s27 }
  0x36   : > { %p777_p5 = pneg %p776_p3  ;;  %p781_p2 = por %p780_p9, %p779_p7 }
  0x38   : > { %p783_p4 = por %p782_p1, %p781_p2 }
  0x3a   : > { %p784_p6 = pnand %p783_p4, %p777_p5 }
  0x3c   : > { %787 = shalt.err (!%p784_p6)
}
  0x3d   : > { %s788_s7 = scalar_lea.vmem %s1005_s22, 1024  ;;  %s878_s18 = smov [#allocation2]  }
  0x3e   : > { %p789_p8 = scmp.ne.s32.totalorder %s1005_s22, %s788_s7  ;;  %s793_s24 = sshll.u32 %s878_s18, 4  ;;  %s794_s24 = int_to_ptr.vmem [resolvable:$false] %s793_s24 }
  0x3f   : > { %s795_s25 = scalar_lea.vmem %s794_s24, 2048  ;;  %p796_p3 = scmp.lt.s32.totalorder %s1005_s22, %s794_s24 }
  0x40   : > { %p791_p10 = pnand %p789_p8, %p775_p0  ;;  %p797_p7 = scmp.lt.s32.totalorder %s795_s25, %s788_s7 }
  0x42   : > { %p792_p13 = pneg %p791_p10  ;;  %p798_p9 = por %p797_p7, %p796_p3 }
  0x44   : > { %p799_p2 = pnand %p798_p9, %p792_p13 }
  0x46   : > { %802 = shalt.err (!%p799_p2)
}
  0x47   : > { %s879_s20 = smov 256   ;;  %s880_s26 = smov 16  }
  0x48   : > { %657 = dma.hbm_to_vmem [thread:$0]  (!%p1001_p11), %s999_s27, 1024, %s1005_s22, %s1007_s28, %s879_s20, %s879_s20, %s880_s26  }
  0x49   : > { %p1146_p0 = scmp.ne.s32.totalorder %s1141_s17, 0 }
  0x4a   : > { %s1038_s19 = sand.u32 (!%p1146_p0), 1, %s865_s10   ;;  %p1147_p5 = scmp.ne.s32.totalorder (!%p1146_p0), %s1139_s15, 0 }
  0x4b   : > { %147 = sbr.rel (%p1146_p0) target bundleno = 492 (0x1ec), region = 28  ;;  %s552_s29 = sshll.u32 (!%p1146_p0), %s1038_s19, 6 }
  0x4c   : > { %s150_s30 = scalar_lea.sflag (!%p1146_p0), [#allocation3], %s1038_s19  ;;  %s153_s3 = scalar_lea.vmem (!%p1146_p0), [#allocation2], %s552_s29 }
  0x52   : > { %848 = dma.done.wait (%p1147_p5), %s150_s30, 1024  }
  0x53   : > { %850 = vsyncadd (%p1147_p5), %s150_s30, 4294966272  ;;  %p1148_p1 = scmp.eq.s32.totalorder %s920_s13, 0 }
  0x55   : > { %852 = dma.done.wait (%p1148_p1), [#allocation6], 2048   ;;  %p1149_p11 = pmov %p1148_p1 }
  0x56   : > { %v1050_v0 = vld [vmem:[%s153_s3 + $0x20] sm:$0xff]  ;;  %v1052_v1 = vld [vmem:[%s153_s3 + $0x28] sm:$0xff]  ;;  %v1060_v5 = vld [vmem:[%s153_s3 + $0x30] sm:$0xff]  ;;  %s554_s15 = sshll.u32 %s1038_s19, 4  ;;  %s586_s22 = sshll.u32 %s920_s13, 8 }
  0x57   : > { %854 = vsyncadd (%p1149_p11), [#allocation6], 4294965248  ;;  %v1054_v2 = vld [vmem:[%s153_s3] sm:$0xff]  ;;  %v195_v3 = vmax.f32 %v1050_v0, %v1052_v1  ;;  %v1058_v4 = vld [vmem:[%s153_s3 + $0x8] sm:$0xff]  ;;  %s177_s17 = scalar_lea.vmem [#allocation7], %s554_s15  ;;  %s1089_s4 = scalar_lea.hbm %s1135_s2, %s586_s22 }
  0x58   : > { %v1062_v6 = vld [vmem:[%s153_s3 + $0x38] sm:$0xff]  ;;  %v189_v7 = vmax.f32 %v1054_v2, %v1058_v4  ;;  %v1066_v8 = vld [vmem:[%s153_s3 + $0x10] sm:$0xff]  ;;  %v705_v11 = vld [vmem:[#allocation5 + $0x40] sm:$0xff]   ;;  %s460_s27 = sshll.u32 %s177_s17, 4  ;;  %s447_s5 = scalar_lea.sflag [#allocation4], %s1038_s19  ;;  %s1084_s27 = int_to_ptr.vmem [resolvable:$true] %s460_s27 }
  0x59   : > { %v1068_v9 = vld [vmem:[%s153_s3 + $0x18] sm:$0xff]  ;;  %196 = vmax.xlane.f32.xlu1 %v195_v3  ;;  %v198_v10 = vmax.f32 %v1060_v5, %v1062_v6  ;;  %v706_v13 = vld [vmem:[#allocation5] sm:$0xff]   ;;  %598 = vmatprep.subr.bf16.mxu0 %v705_v11  ;;  %v707_v14 = vld [vmem:[#allocation5 + $0x48] sm:$0xff]   ;;  %s803_s6 = scalar_lea.vmem %s1084_s27, 256  ;;  %s881_s13 = smov [#allocation7]  }
  0x5a   : > { %190 = vmax.xlane.f32.xlu0 %v189_v7  ;;  %v192_v12 = vmax.f32 %v1066_v8, %v1068_v9  ;;  %626 = vmatprep.subr.bf16.mxu1 %v705_v11  ;;  %v708_v15 = vld [vmem:[#allocation5 + $0x8] sm:$0xff]   ;;  %v709_v16 = vld [vmem:[#allocation5 + $0x50] sm:$0xff]   ;;  %v711_v18 = vld [vmem:[#allocation5 + $0x58] sm:$0xff]   ;;  %p804_p4 = scmp.ne.s32.totalorder %s1084_s27, %s803_s6  ;;  %s807_s7 = sshll.u32 %s881_s13, 4  ;;  %s808_s7 = int_to_ptr.vmem [resolvable:$false] %s807_s7 }
  0x5b   : > { %599 = vmatpush3.bf16.msra.mxu0 %v706_v13  ;;  %634 = vmatpush3.bf16.msra.mxu1 %v706_v13  ;;  %v710_v17 = vld [vmem:[#allocation5 + $0x10] sm:$0xff]   ;;  %v712_v19 = vld [vmem:[#allocation5 + $0x18] sm:$0xff]   ;;  %v713_v20 = vld [vmem:[#allocation5 + $0x60] sm:$0xff]   ;;  %s809_s18 = scalar_lea.vmem %s808_s7, 512  ;;  %p810_p10 = scmp.lt.s32.totalorder %s1084_s27, %s808_s7 }
  0x5c   : > { %600 = vmatprep.subr.bf16.mxu0 %v707_v14  ;;  %627 = vmatprep.subr.bf16.mxu1 %v707_v14  ;;  %v714_v21 = vld [vmem:[#allocation5 + $0x20] sm:$0xff]   ;;  %v715_v22 = vld [vmem:[#allocation5 + $0x68] sm:$0xff]   ;;  %v717_v24 = vld [vmem:[#allocation5 + $0x70] sm:$0xff]   ;;  %p805_p6 = pnand %p804_p4, %p990_p12  ;;  %p811_p13 = scmp.lt.s32.totalorder %s809_s18, %s803_s6 }
  0x5d   : > { %199 = vmax.xlane.f32.xlu1 %v198_v10  ;;  %v716_v23 = vld [vmem:[#allocation5 + $0x28] sm:$0xff]   ;;  %v718_v25 = vld [vmem:[#allocation5 + $0x30] sm:$0xff]   ;;  %v719_v26 = vld [vmem:[#allocation5 + $0x78] sm:$0xff]  }
  0x5e   : > { %193 = vmax.xlane.f32.xlu0 %v192_v12  ;;  %v720_v27 = vld [vmem:[#allocation5 + $0x38] sm:$0xff]   ;;  %p806_p8 = pneg %p805_p6  ;;  %p812_p3 = por %p811_p13, %p810_p10 }
  0x5f   : > { %601 = vmatpush3.bf16.msra.mxu0 %v708_v15  ;;  %635 = vmatpush3.bf16.msra.mxu1 %v708_v15 }
  0x60   : > { %602 = vmatprep.subr.bf16.mxu0 %v709_v16  ;;  %628 = vmatprep.subr.bf16.mxu1 %v709_v16  ;;  %p813_p7 = pnand %p812_p3, %p806_p8 }
  0x63   : > { %603 = vmatpush3.bf16.msra.mxu0 %v710_v17  ;;  %636 = vmatpush3.bf16.msra.mxu1 %v710_v17 }
  0x64   : > { %604 = vmatprep.subr.bf16.mxu0 %v711_v18  ;;  %629 = vmatprep.subr.bf16.mxu1 %v711_v18 }
  0x67   : > { %605 = vmatpush3.bf16.msra.mxu0 %v712_v19  ;;  %637 = vmatpush3.bf16.msra.mxu1 %v712_v19 }
  0x68   : > { %606 = vmatprep.subr.bf16.mxu0 %v713_v20  ;;  %630 = vmatprep.subr.bf16.mxu1 %v713_v20 }
  0x6b   : > { %607 = vmatpush3.bf16.msra.mxu0 %v714_v21  ;;  %638 = vmatpush3.bf16.msra.mxu1 %v714_v21 }
  0x6c   : > { %608 = vmatprep.subr.bf16.mxu0 %v715_v22  ;;  %631 = vmatprep.subr.bf16.mxu1 %v715_v22 }
  0x6f   : > { %609 = vmatpush3.bf16.msra.mxu0 %v716_v23  ;;  %639 = vmatpush3.bf16.msra.mxu1 %v716_v23 }
  0x70   : > { %610 = vmatprep.subr.bf16.mxu0 %v717_v24  ;;  %632 = vmatprep.subr.bf16.mxu1 %v717_v24 }
  0x73   : > { %611 = vmatpush3.bf16.msra.mxu0 %v718_v25  ;;  %640 = vmatpush3.bf16.msra.mxu1 %v718_v25 }
  0x74   : > { %612 = vmatprep.subr.bf16.mxu0 %v719_v26  ;;  %633 = vmatprep.subr.bf16.mxu1 %v719_v26 }
  0x77   : > { %613 = vmatpush3.bf16.msra.mxu0 %v720_v27  ;;  %641 = vmatpush3.bf16.msra.mxu1 %v720_v27 }
  0xe6   : > { %v197_v28 = vpop.xlane.xlu1 %196 }
  0xe7   : > { %v205_v29 = vsub.f32 %v1050_v0, %v197_v28  ;;  %v206_v30 = vsub.f32 %v1052_v1, %v197_v28  ;;  %v191_v31 = vpop.xlane.xlu0 %190 }
  0xe8   : > { %v201_v32 = vsub.f32 %v1054_v2, %v191_v31  ;;  %v202_v33 = vsub.f32 %v1058_v4, %v191_v31 }
  0xe9   : > { %v217_v34 = vmul.f32 1.442695, %v205_v29  ;;  %v219_v35 = vmul.f32 1.442695, %v206_v30 }
  0xea   : > { %v209_v36 = vmul.f32 1.442695, %v201_v32  ;;  %v211_v37 = vmul.f32 1.442695, %v202_v33  ;;  %v200_v38 = vpop.xlane.xlu1 %199 }
  0xeb   : > { %721 = vpow2.f32 %v217_v34  ;;  %v207_v39 = vsub.f32 %v1060_v5, %v200_v38  ;;  %v208_v40 = vsub.f32 %v1062_v6, %v200_v38  ;;  %v194_v41 = vpop.xlane.xlu0 %193 }
  0xec   : > { %723 = vpow2.f32 %v219_v35  ;;  %v203_v42 = vsub.f32 %v1066_v8, %v194_v41  ;;  %v204_v43 = vsub.f32 %v1068_v9, %v194_v41 }
  0xed   : > { %725 = vpow2.f32 %v209_v36  ;;  %v221_v44 = vmul.f32 1.442695, %v207_v39  ;;  %v223_v45 = vmul.f32 1.442695, %v208_v40 }
  0xee   : > { %727 = vpow2.f32 %v211_v37  ;;  %v213_v46 = vmul.f32 1.442695, %v203_v42  ;;  %v215_v47 = vmul.f32 1.442695, %v204_v43 }
  0xef   : > { %729 = vpow2.f32 %v221_v44 }
  0xf0   : > { %731 = vpow2.f32 %v223_v45 }
  0xf1   : > { %733 = vpow2.f32 %v213_v46 }
  0xf2   : > { %735 = vpow2.f32 %v215_v47 }
  0xf5   : > { %v722_v48 = vpop.eup %721 }
  0xf6   : > { %v724_v49 = vpop.eup %723 }
  0xf7   : > { %v726_v50 = vpop.eup %725  ;;  %v231_v60 = vadd.f32 %v724_v49, %v722_v48 }
  0xf8   : > { %v728_v51 = vpop.eup %727 }
  0xf9   : > { %v730_v52 = vpop.eup %729  ;;  %v225_v53 = vadd.f32 %v728_v51, %v726_v50 }
  0xfa   : > { %v732_v54 = vpop.eup %731  ;;  %v239_v55 = vpack.c.bf16 %v730_v52, %v722_v48 }
  0xfb   : > { %v734_v56 = vpop.eup %733  ;;  %226 = vadd.xlane.f32.xlu0 %v225_v53  ;;  %v240_v57 = vpack.c.bf16 %v732_v54, %v724_v49  ;;  %v234_v63 = vadd.f32 %v732_v54, %v730_v52 }
  0xfc   : > { %v736_v58 = vpop.eup %735  ;;  %v237_v59 = vpack.c.bf16 %v734_v56, %v726_v50 }
  0xfd   : > { %409 = vmatprep.mubr.bf16.mxu1 %v240_v57  ;;  %v238_v61 = vpack.c.bf16 %v736_v58, %v728_v51  ;;  %v228_v62 = vadd.f32 %v736_v58, %v734_v56 }
  0xfe   : > { %410 = vmatmul.mubr.bf16.vlgmr.msra.gmra.mrb[0].mxu1 %v239_v55 }
  0xff   : > { %232 = vadd.xlane.f32.xlu0 %v231_v60  ;;  %401 = vmatprep.mubr.bf16.mxu0 %v238_v61 }
 0x100   : > { %229 = vadd.xlane.f32.xlu1 %v228_v62  ;;  %402 = vmatmul.mubr.bf16.vlgmr.msra.gmra.mrb[0].mxu0 %v237_v59 }
 0x104   : > { %235 = vadd.xlane.f32.xlu1 %v234_v63 }
 0x188   : > { %v227_v0 = vpop.xlane.xlu0 %226 }
 0x18c   : > { %v233_v2 = vpop.xlane.xlu0 %232 }
 0x18d   : > { %v230_v1 = vpop.xlane.xlu1 %229  ;;  %737 = vrcp.f32 %v233_v2 }
 0x191   : > { %v236_v3 = vpop.xlane.xlu1 %235 }
 0x192   : > { %739 = vrcp.f32 %v236_v3 }
 0x193   : > { %741 = vrcp.f32 %v227_v0 }
 0x194   : > { %743 = vrcp.f32 %v230_v1 }
 0x197   : > { %v738_v11 = vpop.eup %737 }
 0x19c   : > { %v740_v15 = vpop.eup %739 }
 0x19d   : > { %v742_v17 = vpop.eup %741 }
 0x19e   : > { %v744_v21 = vpop.eup %743 }
 0x1d1   : > { %v620_v4 = vpop.f32.mrb[0].mxu1 }
 0x1d2   : > { %v621_v5 = vpop.f32.mrb[1].mxu1 }
 0x1d3   : > { %v614_v6 = vpop.f32.mrb[0].mxu0  ;;  %v622_v7 = vadd.f32 %v621_v5, %v620_v4  ;;  %v623_v8 = vpop.f32.mrb[2].mxu1 }
 0x1d4   : > { %v615_v9 = vpop.f32.mrb[1].mxu0  ;;  %v624_v10 = vpop.f32.mrb[3].mxu1 }
 0x1d5   : > { %v616_v12 = vadd.f32 %v615_v9, %v614_v6  ;;  %v617_v13 = vpop.f32.mrb[2].mxu0  ;;  %v625_v14 = vadd.f32 %v624_v10, %v623_v8  ;;  %v424_v18 = vmul.f32 %v738_v11, %v622_v7 }
 0x1d6   : > { %v618_v16 = vpop.f32.mrb[3].mxu0 }
 0x1d7   : > { %v619_v19 = vadd.f32 %v618_v16, %v617_v13  ;;  %v425_v20 = vmul.f32 %v740_v15, %v625_v14  ;;  %v422_v22 = vmul.f32 %v742_v17, %v616_v12 }
 0x1d9   : > { %v423_v23 = vmul.f32 %v744_v21, %v619_v19  ;;  %v595_v24 = vpack.c.bf16 %v425_v20, %v424_v18 }
 0x1db   : > { %v590_v25 = vpack.c.bf16 %v423_v23, %v422_v22  ;;  %597 = vst [vmem:[%s177_s17 + $0x8] sm:$0xff] %v595_v24  }
 0x1dd   : > { %591 = vst [vmem:[%s177_s17] sm:$0xff] %v590_v25  }
 0x1de   : > { %816 = shalt.err (!%p813_p7)
}
 0x1df   : > { %s817_s24 = scalar_lea.hbm %s1089_s4, 256  ;;  %s821_s26 = scalar_lea.hbm %s1135_s2, 512 }
 0x1e0   : > { %p818_p9 = scmp.ne.s32.totalorder %s1089_s4, %s817_s24  ;;  %p822_p5 = scmp.lt.u32.totalorder %s1089_s4, %s1135_s2 }
 0x1e1   : > { %p823_p1 = scmp.lt.u32.totalorder %s821_s26, %s817_s24  ;;  %p825_p4 = scmp.lt.u32.totalorder %s817_s24, %s1089_s4 }
 0x1e2   : > { %p819_p2 = pnand %p818_p9, %p990_p12 }
 0x1e3   : > { %p824_p11 = por %p823_p1, %p822_p5 }
 0x1e4   : > { %p820_p0 = pneg %p819_p2 }
 0x1e5   : > { %p826_p6 = por %p825_p4, %p824_p11 }
 0x1e7   : > { %p827_p8 = pnand %p826_p6, %p820_p0 }
 0x1e9   : > { %830 = shalt.err (!%p827_p8)
}
 0x1ea   : > { %s882_s3 = smov 64   ;;  %s883_s15 = smov 4  }
 0x1eb   : > { %648 = dma.vmem_to_hbm [thread:$0]  (%p990_p12), %s1084_s27, 256, %s1089_s4, %s447_s5, %s882_s3, %s882_s3, %s883_s15  }
 0x1ec PF: > { %s475_s17 = sand.u32 1, %s861_s9   ;;  %p1150_p10 = scmp.ne.s32.totalorder %s1140_s16, 0 }
 0x1ed   : > { %p1151_p13 = scmp.ge.s32.totalorder %s873_s12, 2  ;;  %s476_s22 = scalar_lea.sflag [#allocation4], %s475_s17 }
 0x1ef   : > { %p659_p3 = pnand %p1151_p13, %p1150_p10 }
 0x1f1   : > { %856 = dma.done.wait (!%p659_p3), %s476_s22, 256  }
 0x1f2   : > { %858 = vsyncadd (!%p659_p3), %s476_s22, 4294967040  ;;  %p16_p7 = scmp.ge.s32.totalorder %s955_s21, 4   ;;  %s1152_s9 = smov %s865_s10 }
 0x1f3   : > { %s1153_s10 = smov %s869_s11  ;;  %s1154_s11 = smov %s986_s8 }
 0x1f4   : > { %s1155_s12 = smov %s955_s21  ;;  %18 = sbr.rel (!%p16_p7) target bundleno = 6 (0x6), region = 77 }
 0x1fb   :  { %481 = vsyncpa [#allocation3], 1 }
 0x1fc   :  { %483 = vsyncpa [#allocation3 + $0x1], 1 }
 0x1fd   :  { %484 = vsyncpa [#allocation6], 1 }
 0x1fe   :  { %485 = vsyncpa [#allocation4], 1 }
 0x1ff   :  { %487 = vsyncpa [#allocation4 + $0x1], 1 }

</bundles_post_ra>
